<compile_context>
chip_gen: v7x
topology: tpu7x:2x2x1
jax: 0.10.0
libtpu: 0.0.40
codegen_flags: <defaults>
</compile_context>

<pallas_src>
import jax
import jax.numpy as jnp
from jax import lax
from jax.experimental import pallas as pl
from jax.experimental.pallas import tpu as pltpu


def _round_up(x, m):
    return ((x + m - 1) // m) * m


def _row_align(dtype):
    # sublane packing: fp32 -> 8 rows per vreg, bf16 -> 16, int8/fp8 -> 32
    return max(8, 32 // jnp.dtype(dtype).itemsize)


def _vmem_budget_bytes():
    # Physical VMEM per TensorCore with headroom for compiler scratch.
    try:
        cap = int(pltpu.get_tpu_info().vmem_capacity_bytes)
    except Exception:
        cap = 64 << 20  # v7x-safe fallback
    return (cap * 3) // 4


# --------------------------------------------------------------------------
# Single-pass kernel (used by both the single-shot and weight-resident paths)
#   x: (tm, K)  w: (N, K)  b: (1, N)  ->  o: (tm, N)
# --------------------------------------------------------------------------
def _linear_single_kernel(x_ref, w_ref, b_ref, o_ref):
    acc = lax.dot_general(
        x_ref[...],
        w_ref[...],
        dimension_numbers=(((1,), (1,)), ((), ())),  # contract K vs K: x @ W^T
        preferred_element_type=jnp.float32,
    )
    o_ref[...] = (acc + b_ref[...].astype(jnp.float32)).astype(o_ref.dtype)


# --------------------------------------------------------------------------
# Tiled kernel: general shapes, K is the (last, "arbitrary") reduction axis.
# --------------------------------------------------------------------------
def _linear_tiled_kernel(x_ref, w_ref, b_ref, o_ref, acc_ref):
    k = pl.program_id(2)

    @pl.when(k == 0)
    def _():
        # Seed accumulator with the bias: epilogue is just cast + store.
        acc_ref[...] = jnp.broadcast_to(
            b_ref[...].astype(jnp.float32), acc_ref.shape
        )

    acc_ref[...] += lax.dot_general(
        x_ref[...],           # (tm, tk)
        w_ref[...],           # (tn, tk)  -- contract on K, i.e. x @ W^T
        dimension_numbers=(((1,), (1,)), ((), ())),
        preferred_element_type=jnp.float32,
    )

    @pl.when(k == pl.num_programs(2) - 1)
    def _():
        o_ref[...] = acc_ref[...].astype(o_ref.dtype)


def linear_regression_forward(
    x, weight, bias=None, *, tm=None, tn=None, tk=None, force_path=None
):
    """Pallas equivalent of LinearRegression.forward (torch.nn.Linear).

    x:      [M, K]  (batch, input_size)
    weight: [N, K]  (output_size, input_size)  -- PyTorch Linear convention
    bias:   [N] or None
    returns [M, N]
    """
    M, K = x.shape
    N, K2 = weight.shape
    assert K == K2
    out_dtype = x.dtype
    if bias is None:
        bias = jnp.zeros((N,), out_dtype)
    b2 = bias.reshape(1, N)

    def isz(a):
        return jnp.dtype(a.dtype).itemsize

    o_isz = jnp.dtype(out_dtype).itemsize
    x_bytes = M * K * isz(x)
    w_bytes = N * K * isz(weight)
    b_bytes = N * isz(bias)
    o_bytes = M * N * o_isz
    total_bytes = x_bytes + w_bytes + b_bytes + o_bytes

    budget = _vmem_budget_bytes()
    vmem_limit = int(min(budget, 100 << 20))
    row_align = _row_align(x.dtype)

    cost = pl.CostEstimate(
        flops=2 * M * N * K,
        transcendentals=0,
        bytes_accessed=total_bytes,
    )

    # Dispatch thresholds (generation-aware via the VMEM budget).
    single_shot_max = min(budget // 4, 16 << 20)
    w_resident_max = min(budget // 3, 16 << 20)

    path = force_path
    if path is None:
        if total_bytes <= single_shot_max:
            path = "single"
        elif w_bytes + b_bytes <= w_resident_max:
            path = "weight_resident"
        else:
            path = "tiled"

    # ---------------------------- single-shot ----------------------------
    if path == "single":
        return pl.pallas_call(
            _linear_single_kernel,
            out_shape=jax.ShapeDtypeStruct((M, N), out_dtype),
            grid_spec=pltpu.PrefetchScalarGridSpec(
                num_scalar_prefetch=0,
                grid=(1,),
                in_specs=[
                    pl.BlockSpec((M, K), lambda i: (0, 0)),
                    pl.BlockSpec((N, K), lambda i: (0, 0)),
                    pl.BlockSpec((1, N), lambda i: (0, 0)),
                ],
                out_specs=pl.BlockSpec((M, N), lambda i: (0, 0)),
            ),
            compiler_params=pltpu.CompilerParams(
                dimension_semantics=("arbitrary",),
                vmem_limit_bytes=vmem_limit,
            ),
            cost_estimate=cost,
        )(x, weight, b2)

    # -------------------------- weight-resident --------------------------
    if path == "weight_resident":
        tm_ = 512 if tm is None else tm
        tm_ = min(_round_up(tm_, row_align), _round_up(M, row_align))

        def wr_bytes(t):
            # double-buffered x + out tiles, plus the resident W / bias
            return (2 * t * K * isz(x) + 2 * t * N * o_isz
                    + w_bytes + b_bytes)

        while tm_ > row_align and wr_bytes(tm_) > vmem_limit:
            tm_ = max(row_align, tm_ // 2)

        grid_m = pl.cdiv(M, tm_)
        return pl.pallas_call(
            _linear_single_kernel,
            out_shape=jax.ShapeDtypeStruct((M, N), out_dtype),
            grid_spec=pltpu.PrefetchScalarGridSpec(
                num_scalar_prefetch=0,
                grid=(grid_m,),
                in_specs=[
                    pl.BlockSpec((tm_, K), lambda i: (i, 0)),
                    # constant index_map -> W / bias DMA'd once, stay resident
                    pl.BlockSpec((N, K), lambda i: (0, 0)),
                    pl.BlockSpec((1, N), lambda i: (0, 0)),
                ],
                out_specs=pl.BlockSpec((tm_, N), lambda i: (i, 0)),
            ),
            compiler_params=pltpu.CompilerParams(
                dimension_semantics=("parallel",),   # shards over v7x's 2 TCs
                vmem_limit_bytes=vmem_limit,
            ),
            cost_estimate=cost,
        )(x, weight, b2)

    # ----------------------------- tiled path ----------------------------
    tm_ = 512 if tm is None else tm
    tn_ = 512 if tn is None else tn
    tk_ = 1024 if tk is None else tk
    tm_ = min(_round_up(tm_, row_align), _round_up(M, row_align))
    tn_ = min(_round_up(tn_, 128), _round_up(N, 128))
    tk_ = min(_round_up(tk_, 128), _round_up(K, 128))

    def tiled_bytes(a, b, c):
        return (2 * a * c * isz(x) + 2 * b * c * isz(weight)
                + 2 * a * b * o_isz + a * b * 4 + 2 * b * isz(bias))

    while tiled_bytes(tm_, tn_, tk_) > vmem_limit and tk_ > 128:
        tk_ = max(128, tk_ // 2)
    while tiled_bytes(tm_, tn_, tk_) > vmem_limit and (tm_ > row_align or tn_ > 128):
        if tm_ >= tn_ and tm_ > row_align:
            tm_ = max(row_align, tm_ // 2)
        else:
            tn_ = max(128, tn_ // 2)

    # Only K needs genuine zeros: a garbage K tail would corrupt valid output;
    # M/N tail garbage only lands in masked-out rows/cols of the edge blocks.
    Kp = _round_up(K, tk_)
    xp = x if Kp == K else jnp.pad(x, ((0, 0), (0, Kp - K)))
    wp = weight if Kp == K else jnp.pad(weight, ((0, 0), (0, Kp - K)))

    grid = (pl.cdiv(M, tm_), pl.cdiv(N, tn_), Kp // tk_)

    return pl.pallas_call(
        _linear_tiled_kernel,
        out_shape=jax.ShapeDtypeStruct((M, N), out_dtype),
        grid_spec=pltpu.PrefetchScalarGridSpec(
            num_scalar_prefetch=0,
            grid=grid,
            in_specs=[
                pl.BlockSpec((tm_, tk_), lambda i, j, k: (i, k)),  # x tile
                pl.BlockSpec((tn_, tk_), lambda i, j, k: (j, k)),  # W tile (N,K)
                pl.BlockSpec((1, tn_), lambda i, j, k: (0, j)),    # bias tile
            ],
            out_specs=pl.BlockSpec((tm_, tn_), lambda i, j, k: (i, j)),
            scratch_shapes=[pltpu.VMEM((tm_, tn_), jnp.float32)],
        ),
        compiler_params=pltpu.CompilerParams(
            dimension_semantics=("parallel", "parallel", "arbitrary"),
            vmem_limit_bytes=vmem_limit,
        ),
        cost_estimate=cost,
    )(xp, wp, b2)


if __name__ == "__main__":
    key = jax.random.PRNGKey(0)

    def make_problem(k, m, kk, n):
        kx, kw, kb = jax.random.split(k, 3)
        bound = 1.0 / jnp.sqrt(jnp.float32(kk))
        w = jax.random.uniform(kw, (n, kk), jnp.float32, -bound, bound)
        b = jax.random.uniform(kb, (n,), jnp.float32, -bound, bound)
        xx = jax.random.normal(kx, (m, kk), jnp.float32)
        return xx, w, b

    def ref_fn(xx, w, b):
        return jnp.dot(xx, w.T, precision=lax.Precision.HIGHEST) + b

    k1, k2, k3 = jax.random.split(key, 3)

    # 1) LinearRegression(input_size=256, output_size=128), batch=8
    #    -> single-shot path (whole problem in one grid point).
    x1, w1, b1 = make_problem(k1, 8, 256, 128)
    out1 = jax.block_until_ready(linear_regression_forward(x1, w1, b1))
    assert out1.shape == (8, 128)
    assert jnp.allclose(out1, ref_fn(x1, w1, b1), atol=1e-3, rtol=1e-3)

    # 2) Weight-resident path: 1-D grid over M, W/bias fetched once,
    #    non-divisible M exercises masked edge-block writes.
    x2, w2, b2 = make_problem(k2, 300, 256, 192)
    out2 = jax.block_until_ready(
        linear_regression_forward(x2, w2, b2, tm=128, force_path="weight_resident")
    )
    assert out2.shape == (300, 192)
    assert jnp.allclose(out2, ref_fn(x2, w2, b2), atol=1e-3, rtol=1e-3)

    # 3) General tiled path: K accumulation + K-only zero pad + masked M/N
    #    edge blocks (no wrapper M/N padding, no output slice).
    x3, w3, b3 = make_problem(k3, 200, 200, 200)
    out3 = jax.block_until_ready(
        linear_regression_forward(
            x3, w3, b3, tm=128, tn=128, tk=128, force_path="tiled"
        )
    )
    assert out3.shape == (200, 200)
    assert jnp.allclose(out3, ref_fn(x3, w3, b3), atol=1e-3, rtol=1e-3)

    print("KERNEL_OK")
</pallas_src>

<mosaic_0001>
module attributes {stable_mosaic.version = 11 : i64} {
  func.func @_linear_single_kernel(%arg0: i32, %arg1: memref<8x256xf32, #tpu.memory_space<vmem>>, %arg2: memref<128x256xf32, #tpu.memory_space<vmem>>, %arg3: memref<1x128xf32, #tpu.memory_space<vmem>>, %arg4: memref<8x128xf32, #tpu.memory_space<vmem>>) attributes {dimension_semantics = [#tpu.dimension_semantics<arbitrary>], iteration_bounds = array<i64: 1>, scalar_prefetch = 0 : i64, scratch_operands = 0 : i64, tpu.core_type = #tpu.core_type<tc>, window_params = [{pipeline_mode = #tpu.pipeline_mode<synchronous>, transform_indices = @transform_0, window_bounds = array<i64: 8, 256>}, {pipeline_mode = #tpu.pipeline_mode<synchronous>, transform_indices = @transform_1, window_bounds = array<i64: 128, 256>}, {pipeline_mode = #tpu.pipeline_mode<synchronous>, transform_indices = @transform_2, window_bounds = array<i64: 1, 128>}, {pipeline_mode = #tpu.pipeline_mode<synchronous>, transform_indices = @transform_3, window_bounds = array<i64: 8, 128>}]} {
    %c0 = arith.constant 0 : index
    %c0_0 = arith.constant 0 : index
    %0 = vector.load %arg1[%c0, %c0_0] : memref<8x256xf32, #tpu.memory_space<vmem>>, vector<8x256xf32>
    %c0_1 = arith.constant 0 : index
    %c0_2 = arith.constant 0 : index
    %1 = vector.load %arg2[%c0_1, %c0_2] : memref<128x256xf32, #tpu.memory_space<vmem>>, vector<128x256xf32>
    %cst = arith.constant dense<0.000000e+00> : vector<8x128xf32>
    %2 = tpu.matmul %0, %1, %cst {dimension_numbers = #tpu.dot_dimension_numbers<[1], [1], [0], [0], [0, 0, 1, 0], [], []>} : vector<8x256xf32>, vector<128x256xf32>, vector<8x128xf32> -> vector<8x128xf32>
    %c0_3 = arith.constant 0 : index
    %c0_4 = arith.constant 0 : index
    %3 = vector.load %arg3[%c0_3, %c0_4] : memref<1x128xf32, #tpu.memory_space<vmem>>, vector<1x128xf32>
    %4 = vector.broadcast %3 : vector<1x128xf32> to vector<8x128xf32>
    %5 = arith.addf %2, %4 : vector<8x128xf32>
    %c0_5 = arith.constant 0 : index
    %c0_6 = arith.constant 0 : index
    %6 = vector.load %arg4[%c0_5, %c0_6] : memref<8x128xf32, #tpu.memory_space<vmem>>, vector<8x128xf32>
    tpu.vector_store %arg4[%c0_5, %c0_6], %5 {strides = array<i32>} : memref<8x128xf32, #tpu.memory_space<vmem>>, vector<8x128xf32>,
    return
  }
  func.func @transform_0(%arg0: i32) -> (i32, i32) {
    %c0_i32 = arith.constant 0 : i32
    %c0_i32_0 = arith.constant 0 : i32
    %c0_i32_1 = arith.constant 0 : i32
    return %c0_i32, %c0_i32_0 : i32, i32
  }
  func.func @transform_1(%arg0: i32) -> (i32, i32) {
    %c0_i32 = arith.constant 0 : i32
    %c0_i32_0 = arith.constant 0 : i32
    %c0_i32_1 = arith.constant 0 : i32
    return %c0_i32, %c0_i32_0 : i32, i32
  }
  func.func @transform_2(%arg0: i32) -> (i32, i32) {
    %c0_i32 = arith.constant 0 : i32
    %c0_i32_0 = arith.constant 0 : i32
    %c0_i32_1 = arith.constant 0 : i32
    return %c0_i32, %c0_i32_0 : i32, i32
  }
  func.func @transform_3(%arg0: i32) -> (i32, i32) {
    %c0_i32 = arith.constant 0 : i32
    %c0_i32_0 = arith.constant 0 : i32
    %c0_i32_1 = arith.constant 0 : i32
    return %c0_i32, %c0_i32_0 : i32, i32
  }
}

</mosaic_0001>

<bundles_post_ra>
// kernel: tpu_custom_call.1
= control target key start
LH: loop header
LB: loop body
LE: loop exit
PB: predicated region body
PF: predicated region fallthrough
CT: control target
= control target key end

     0   :  { %8 = vsyncpa [#allocation3], 0  ;;  %s350_s0 = inlined_call_operand.hbm [shape: f32[8,256], index: 0, kind: input, shape index: {}]   ;;  %s351_s1 = inlined_call_operand.hbm [shape: f32[128,256], index: 1, kind: input, shape index: {}]   ;;  %s352_s2 = inlined_call_operand.vmem [shape: f32[1,128], index: 2, kind: input, shape index: {}]   ;;  %s353_s3 = inlined_call_operand.hbm [shape: f32[8,128], index: 3, kind: output, shape index: {}]  }
   0x1   :  { %9 = vsyncpa [#allocation6], 0 }
   0x2   :  { %10 = vsyncpa [#allocation4], 0  ;;  %s279_s12 = smov [#allocation2]   ;;  %s280_s14 = smov [#allocation5]  }
   0x3   :  { %s17_s13 = sshll.u32 %s279_s12, 4  ;;  %s26_s15 = sshll.u32 %s280_s14, 4  ;;  %s18_s13 = int_to_ptr.vmem [resolvable:$true] %s17_s13  ;;  %s304_s15 = int_to_ptr.vmem [resolvable:$true] %s26_s15 }
   0x4   :  { %s207_s18 = scalar_lea.hbm %s350_s0, 256 }
   0x5   :  { %p208_p0 = scmp.ne.s32.totalorder %s350_s0, %s207_s18  ;;  %p211_p1 = scmp.lt.u32.totalorder %s207_s18, %s350_s0 }
   0x7   :  { %p213_p2 = pnand %p211_p1, %p208_p0 }
   0x9   :  { %216 = shalt.err (!%p213_p2)
}
   0xa   :  { %s217_s23 = scalar_lea.vmem %s18_s13, 256  ;;  %p222_p4 = scmp.lt.s32.totalorder %s18_s13, %s18_s13 }
   0xb   :  { %p218_p3 = scmp.ne.s32.totalorder %s18_s13, %s217_s23  ;;  %p223_p5 = scmp.lt.s32.totalorder %s217_s23, %s217_s23 }
   0xd   :  { %p224_p6 = por %p223_p5, %p222_p4 }
   0xf   :  { %p225_p7 = pnand %p224_p6, %p218_p3 }
  0x11   :  { %228 = shalt.err (!%p225_p7)
}
  0x12   :  { %20 = dma.hbm_to_vmem [thread:$0]  %s350_s0, 256, %s18_s13, [#allocation3]  }
  0x13   :  { %s229_s28 = scalar_lea.hbm %s351_s1, 4096 }
  0x14   :  { %p230_p8 = scmp.ne.s32.totalorder %s351_s1, %s229_s28  ;;  %p233_p9 = scmp.lt.u32.totalorder %s229_s28, %s351_s1 }
  0x16   :  { %p235_p10 = pnand %p233_p9, %p230_p8 }
  0x18   :  { %238 = shalt.err (!%p235_p10)
}
  0x19   :  { %s239_s6 = scalar_lea.vmem %s304_s15, 4096  ;;  %p244_p12 = scmp.lt.s32.totalorder %s304_s15, %s304_s15 }
  0x1a   :  { %p240_p11 = scmp.ne.s32.totalorder %s304_s15, %s239_s6  ;;  %p245_p13 = scmp.lt.s32.totalorder %s239_s6, %s239_s6 }
  0x1c   :  { %p246_p0 = por %p245_p13, %p244_p12 }
  0x1e   :  { %p247_p1 = pnand %p246_p0, %p240_p11 }
  0x20   :  { %250 = shalt.err (!%p247_p1)
}
  0x21   :  { %s281_s0 = smov 256   ;;  %s282_s7 = smov 16  }
  0x22   :  { %32 = dma.hbm_to_vmem [thread:$0]  %s351_s1, 4096, %s304_s15, [#allocation6], %s281_s0, %s281_s0, %s282_s7  }
  0x23   :  { %273 = dma.done.wait [#allocation3], 256  }
  0x24   :  { %274 = vsyncadd [#allocation3], 4294967040 }
  0x25   :  { %275 = dma.done.wait [#allocation6], 4096  }
  0x26   :  { %276 = vsyncadd [#allocation6], 4294963200  ;;  %v44_v0 = vld [vmem:[#allocation5 + $0x8] sm:$0xff]  ;;  %v46_v1 = vld [vmem:[#allocation5 + $0x18] sm:$0xff]  ;;  %s283_s11 = smov [#allocation7]  }
  0x27   :  { %v43_v2 = vld [vmem:[#allocation5] sm:$0xff]  ;;  %v170_v3 = vpack.c.bf16 %v46_v1, %v44_v0  ;;  %v45_v4 = vld [vmem:[#allocation5 + $0x10] sm:$0xff]  ;;  %v48_v5 = vld [vmem:[#allocation5 + $0x28] sm:$0xff]  ;;  %s159_s12 = sshll.u32 %s283_s11, 4  ;;  %s160_s12 = int_to_ptr.vmem [resolvable:$true] %s159_s12 }
  0x28   :  { %v50_v6 = vld [vmem:[#allocation5 + $0x38] sm:$0xff]  ;;  %v172_v7 = vpack.c.bf16 %v45_v4, %v43_v2  ;;  %v47_v9 = vld [vmem:[#allocation5 + $0x20] sm:$0xff]  ;;  %v49_v10 = vld [vmem:[#allocation5 + $0x30] sm:$0xff]  ;;  %s251_s13 = scalar_lea.vmem %s160_s12, 128  ;;  %p256_p3 = scmp.lt.s32.totalorder %s160_s12, %s160_s12 }
  0x29   :  { %v174_v8 = vpack.c.bf16 %v50_v6, %v48_v5  ;;  %171 = vmatprep.subr.bf16.mxu0 %v170_v3  ;;  %v52_v11 = vld [vmem:[#allocation5 + $0x48] sm:$0xff]  ;;  %v54_v12 = vld [vmem:[#allocation5 + $0x58] sm:$0xff]  ;;  %v176_v13 = vpack.c.bf16 %v49_v10, %v47_v9  ;;  %v51_v16 = vld [vmem:[#allocation5 + $0x40] sm:$0xff]  ;;  %p252_p2 = scmp.ne.s32.totalorder %s160_s12, %s251_s13  ;;  %p257_p4 = scmp.lt.s32.totalorder %s251_s13, %s251_s13 }
  0x2a   :  { %173 = vmatpush1.bf16.xpose.msra.mxu0 %v172_v7  ;;  %v178_v14 = vpack.c.bf16 %v54_v12, %v52_v11  ;;  %v42_v15 = vld [vmem:[#allocation2 + $0x8] sm:$0xff]  ;;  %v53_v17 = vld [vmem:[#allocation5 + $0x50] sm:$0xff]  ;;  %v56_v18 = vld [vmem:[#allocation5 + $0x68] sm:$0xff] }
  0x2b   :  { %175 = vmatprep.subr.bf16.mxu0 %v174_v8  ;;  %146 = vmatprep.mubr.f32.mxu0 %v42_v15  ;;  %v58_v19 = vld [vmem:[#allocation5 + $0x78] sm:$0xff]  ;;  %v180_v20 = vpack.c.bf16 %v53_v17, %v51_v16  ;;  %v55_v22 = vld [vmem:[#allocation5 + $0x60] sm:$0xff]  ;;  %v57_v23 = vld [vmem:[#allocation5 + $0x70] sm:$0xff]  ;;  %p258_p5 = por %p257_p4, %p256_p3 }
  0x2c   :  { %v182_v21 = vpack.c.bf16 %v58_v19, %v56_v18  ;;  %v60_v24 = vld [vmem:[#allocation5 + $0x88] sm:$0xff]  ;;  %v62_v25 = vld [vmem:[#allocation5 + $0x98] sm:$0xff]  ;;  %v184_v26 = vpack.c.bf16 %v57_v23, %v55_v22  ;;  %v59_v28 = vld [vmem:[#allocation5 + $0x80] sm:$0xff] }
  0x2d   :  { %v186_v27 = vpack.c.bf16 %v62_v25, %v60_v24  ;;  %v61_v29 = vld [vmem:[#allocation5 + $0x90] sm:$0xff]  ;;  %v64_v30 = vld [vmem:[#allocation5 + $0xa8] sm:$0xff]  ;;  %v66_v31 = vld [vmem:[#allocation5 + $0xb8] sm:$0xff]  ;;  %p259_p6 = pnand %p258_p5, %p252_p2 }
  0x2e   :  { %v188_v32 = vpack.c.bf16 %v61_v29, %v59_v28  ;;  %v190_v33 = vpack.c.bf16 %v66_v31, %v64_v30  ;;  %v63_v34 = vld [vmem:[#allocation5 + $0xa0] sm:$0xff]  ;;  %v65_v35 = vld [vmem:[#allocation5 + $0xb0] sm:$0xff]  ;;  %v68_v36 = vld [vmem:[#allocation5 + $0xc8] sm:$0xff] }
  0x2f   :  { %v70_v37 = vld [vmem:[#allocation5 + $0xd8] sm:$0xff]  ;;  %v192_v38 = vpack.c.bf16 %v65_v35, %v63_v34  ;;  %v67_v40 = vld [vmem:[#allocation5 + $0xc0] sm:$0xff]  ;;  %v69_v41 = vld [vmem:[#allocation5 + $0xd0] sm:$0xff] }
  0x30   :  { %v194_v39 = vpack.c.bf16 %v70_v37, %v68_v36  ;;  %v72_v42 = vld [vmem:[#allocation5 + $0xe8] sm:$0xff]  ;;  %v74_v43 = vld [vmem:[#allocation5 + $0xf8] sm:$0xff]  ;;  %v196_v44 = vpack.c.bf16 %v69_v41, %v67_v40  ;;  %v71_v46 = vld [vmem:[#allocation5 + $0xe0] sm:$0xff] }
  0x31   :  { %v198_v45 = vpack.c.bf16 %v74_v43, %v72_v42  ;;  %v73_v47 = vld [vmem:[#allocation5 + $0xf0] sm:$0xff] }
  0x32   :  { %177 = vmatpush1.bf16.xpose.msra.mxu0 %v176_v13  ;;  %v200_v48 = vpack.c.bf16 %v73_v47, %v71_v46  ;;  %v41_v49 = vld [vmem:[#allocation2] sm:$0xff] }
  0x33   :  { %179 = vmatprep.subr.bf16.mxu0 %v178_v14  ;;  %v169_v50 = vld [vmem:[%s352_s2] ss:$0 sm:$0xff] }
  0x3a   :  { %181 = vmatpush1.bf16.xpose.msra.mxu0 %v180_v20 }
  0x3b   :  { %183 = vmatprep.subr.bf16.mxu0 %v182_v21 }
  0x42   :  { %185 = vmatpush1.bf16.xpose.msra.mxu0 %v184_v26 }
  0x43   :  { %187 = vmatprep.subr.bf16.mxu0 %v186_v27 }
  0x4a   :  { %189 = vmatpush1.bf16.xpose.msra.mxu0 %v188_v32 }
  0x4b   :  { %191 = vmatprep.subr.bf16.mxu0 %v190_v33 }
  0x52   :  { %193 = vmatpush1.bf16.xpose.msra.mxu0 %v192_v38 }
  0x53   :  { %195 = vmatprep.subr.bf16.mxu0 %v194_v39 }
  0x5a   :  { %197 = vmatpush1.bf16.xpose.msra.mxu0 %v196_v44 }
  0x5b   :  { %199 = vmatprep.subr.bf16.mxu0 %v198_v45 }
  0x62   :  { %201 = vmatpush1.bf16.xpose.msra.mxu0 %v200_v48 }
  0x69   :  { %147 = vmatmul.mubr.f32.vlgmr.msra.gmra.mrb[0].mxu0 %v41_v49 }
 0x13c   :  { %v148_v51 = vpop.f32.mrb[0].mxu0 }
 0x13d   :  { %v149_v52 = vadd.f32 %v169_v50, %v148_v51  ;;  %v150_v53 = vpop.f32.mrb[1].mxu0 }
 0x13f   :  { %152 = vst [vmem:[#allocation7] sm:$0xff] %v149_v52 }
 0x140   :  { %262 = shalt.err (!%p259_p6)
}
 0x141   :  { %s263_s16 = scalar_lea.hbm %s353_s3, 128 }
 0x142   :  { %p264_p7 = scmp.ne.s32.totalorder %s353_s3, %s263_s16  ;;  %p267_p8 = scmp.lt.u32.totalorder %s263_s16, %s353_s3 }
 0x144   :  { %p269_p9 = pnand %p267_p8, %p264_p7 }
 0x146   :  { %272 = shalt.err (!%p269_p9)
}
 0x147   :  { %162 = dma.vmem_to_hbm [thread:$0]  %s160_s12, 128, %s353_s3, [#allocation4]  }
 0x148   :  { %277 = dma.done.wait [#allocation4], 128  }
 0x149   :  { %278 = vsyncadd [#allocation4], 4294967168 }
 0x14a   :  { %166 = vsyncpa [#allocation3], 1 }
 0x14b   :  { %167 = vsyncpa [#allocation6], 1 }
 0x14c   :  { %168 = vsyncpa [#allocation4], 1 }

</bundles_post_ra>
